<compile_context>
chip_gen: v7x
topology: tpu7x:2x2x1
jax: 0.10.0
libtpu: 0.0.40
codegen_flags: <defaults>
</compile_context>

<pallas_src>
import functools

import jax
import jax.numpy as jnp
from jax.experimental import pallas as pl
from jax.experimental.pallas import tpu as pltpu

BN_EPS = 1e-5
_F32_BYTES = 4


def block_kernel(x_ref, w_ref, p_ref, o_ref):
    """Fused Linear + ReLU + BatchNorm1d (training-mode batch statistics).

    x_ref: (B, Cin)   activations (compute dtype, e.g. bf16), resident block
    w_ref: (TN, Cin)  weight tile in native PyTorch (Cout, Cin) layout
    p_ref: (3, TN)    f32 params: row 0 = bias, row 1 = gamma, row 2 = beta
    o_ref: (B, TN)    output tile
    """
    # Linear on the MXU: compute-dtype operands, f32 accumulation.
    # Contract x's Cin with w's Cin (i.e. x @ W.T) without transposing W.
    h = jax.lax.dot_general(
        x_ref[...], w_ref[...],
        dimension_numbers=(((1,), (1,)), ((), ())),
        preferred_element_type=jnp.float32)

    p = p_ref[...]                      # (3, TN) f32
    h = h + p[0:1, :]                   # + bias
    h = jnp.maximum(h, 0.0)             # ReLU (VPU)

    # BatchNorm1d over the batch axis (full batch is resident in this block,
    # so the statistics are exact).  One-pass moments, then a single fused
    # per-element scale/shift.
    inv_n = 1.0 / h.shape[0]
    s1 = jnp.sum(h, axis=0, keepdims=True)
    s2 = jnp.sum(h * h, axis=0, keepdims=True)
    mean = s1 * inv_n
    var = jnp.maximum(s2 * inv_n - mean * mean, 0.0)   # guard tiny cancellation
    inv_std = jax.lax.rsqrt(var + BN_EPS)              # EUP slot

    scale = p[1:2, :] * inv_std                        # gamma / sqrt(var+eps)
    shift = p[2:3, :] - mean * scale                   # beta  - mean*scale
    o_ref[...] = (h * scale + shift).astype(o_ref.dtype)


def _round_up(v, m):
    return (v + m - 1) // m * m


def _vmem_limits():
    """(scoped vmem limit to request, planning budget) — generation aware."""
    try:
        cap = int(pltpu.get_tpu_info().vmem_capacity_bytes)
    except Exception:  # be conservative if the query is unavailable
        cap = 64 * 1024 * 1024
    limit = min(cap * 3 // 4, 100 * 1024 * 1024)   # scoped VMEM we request
    budget = limit * 2 // 3                        # headroom for Mosaic scratch
    return limit, budget


def _plan_tiling(batch, cin, cout, comp_itemsize, out_itemsize):
    """Choose the Cout tile TN, the padded Cout, and the scoped VMEM limit."""
    limit, budget = _vmem_limits()

    def footprint(tn):
        resident = batch * cin * comp_itemsize          # x: fetched once
        streamed = 2 * (tn * cin * comp_itemsize        # W tile (double buffered)
                        + 3 * tn * _F32_BYTES           # packed bias/gamma/beta
                        + batch * tn * out_itemsize)    # output tile
        return resident + streamed

    if cout < 256:
        # Single full-width tile: no padding, one grid step.
        if footprint(cout) > budget:
            raise ValueError(
                "Block VMEM plan failed for small Cout: the resident batch "
                f"block ({batch}x{cin}) does not fit the VMEM budget. "
                "TODO(synk): two-pass BN across batch tiles.")
        return cout, cout, limit

    cout128 = _round_up(cout, 128)
    for tn in (2048, 1024, 512, 256, 128):
        if tn > cout128:
            continue
        if cout128 // tn < 2:
            continue   # keep >=2 Cout tiles so "parallel" uses both v7x TCs
        if footprint(tn) <= budget:
            return tn, _round_up(cout, tn), limit

    raise ValueError(
        f"Block VMEM plan failed: batch block {batch}x{cin} plus a 128-wide "
        "Cout tile exceeds the VMEM budget. "
        "TODO(synk): two-pass BN across batch tiles.")


@functools.partial(jax.jit, static_argnames=("compute_dtype", "out_dtype"))
def block_forward(x, w, b, gamma, beta,
                  compute_dtype=jnp.bfloat16, out_dtype=jnp.float32):
    """x: (B, Cin); w: (Cout, Cin) [native PyTorch Linear layout];
    b/gamma/beta: (Cout,).  Set out_dtype=bf16 when the consumer takes bf16."""
    B, Cin = x.shape
    Cout = w.shape[0]

    comp_isz = jnp.dtype(compute_dtype).itemsize
    out_isz = jnp.dtype(out_dtype).itemsize
    tn, cout_pad, vmem_limit = _plan_tiling(B, Cin, Cout, comp_isz, out_isz)

    # Casts only; if inputs are already in compute_dtype these are no-ops.
    x_c = x.astype(compute_dtype)
    w_c = w.astype(compute_dtype)
    params = jnp.stack([b, gamma, beta]).astype(jnp.float32)   # (3, Cout)

    # Pad only the Cout axis, and only when the tile does not divide Cout.
    if cout_pad != Cout:
        w_c = jnp.zeros((cout_pad, Cin), compute_dtype).at[:Cout, :].set(w_c)
        params = jnp.zeros((3, cout_pad), jnp.float32).at[:, :Cout].set(params)

    grid = (cout_pad // tn,)

    out = pl.pallas_call(
        block_kernel,
        out_shape=jax.ShapeDtypeStruct((B, cout_pad), out_dtype),
        grid_spec=pltpu.PrefetchScalarGridSpec(
            num_scalar_prefetch=0,
            grid=grid,
            in_specs=[
                pl.BlockSpec((B, Cin), lambda j: (0, 0)),    # x: resident block
                pl.BlockSpec((tn, Cin), lambda j: (j, 0)),   # W tile (native layout)
                pl.BlockSpec((3, tn), lambda j: (0, j)),     # packed bias/gamma/beta
            ],
            out_specs=pl.BlockSpec((B, tn), lambda j: (0, j)),
        ),
        compiler_params=pltpu.CompilerParams(
            dimension_semantics=("parallel",),   # shard Cout tiles across TCs
            vmem_limit_bytes=int(vmem_limit),
        ),
    )(x_c, w_c, params)

    return out[:, :Cout] if cout_pad != Cout else out


def block_reference(x, w, b, gamma, beta, compute_dtype=jnp.bfloat16):
    """Pure-JAX reference with matching numerics (bf16 matmul, f32 epilogue)."""
    h = jnp.dot(x.astype(compute_dtype), w.T.astype(compute_dtype),
                preferred_element_type=jnp.float32) + b.astype(jnp.float32)
    h = jnp.maximum(h, 0.0)
    mean = jnp.mean(h, axis=0, keepdims=True)
    var = jnp.mean((h - mean) ** 2, axis=0, keepdims=True)
    return (h - mean) * jax.lax.rsqrt(var + BN_EPS) * gamma + beta


if __name__ == "__main__":
    # Small shapes consistent with the module: batch=8, input_size=32, output_size=64
    B, Cin, Cout = 8, 32, 64

    key = jax.random.PRNGKey(0)
    kx, kw, kb = jax.random.split(key, 3)

    # PyTorch-like init: Linear weight/bias ~ U(-1/sqrt(Cin), 1/sqrt(Cin)),
    # BatchNorm1d gamma=1, beta=0.
    bound = 1.0 / (Cin ** 0.5)
    w = jax.random.uniform(kw, (Cout, Cin), jnp.float32, -bound, bound)
    b = jax.random.uniform(kb, (Cout,), jnp.float32, -bound, bound)
    gamma = jnp.ones((Cout,), jnp.float32)
    beta = jnp.zeros((Cout,), jnp.float32)

    x = jax.random.normal(kx, (B, Cin), jnp.float32)

    out = block_forward(x, w, b, gamma, beta)
    out = jax.block_until_ready(out)

    ref = block_reference(x, w, b, gamma, beta)
    assert out.shape == (B, Cout), out.shape
    assert jnp.allclose(out, ref, atol=2e-3, rtol=2e-3), "mismatch vs reference"

    print("KERNEL_OK")
</pallas_src>

<mosaic_0001>
module attributes {stable_mosaic.version = 11 : i64} {
  func.func @block_kernel(%arg0: i32, %arg1: memref<8x32xbf16, #tpu.memory_space<vmem>>, %arg2: memref<64x32xbf16, #tpu.memory_space<vmem>>, %arg3: memref<3x64xf32, #tpu.memory_space<vmem>>, %arg4: memref<8x64xf32, #tpu.memory_space<vmem>>) attributes {dimension_semantics = [#tpu.dimension_semantics<parallel>], iteration_bounds = array<i64: 1>, scalar_prefetch = 0 : i64, scratch_operands = 0 : i64, tpu.core_type = #tpu.core_type<tc>, window_params = [{pipeline_mode = #tpu.pipeline_mode<synchronous>, transform_indices = @transform_0, window_bounds = array<i64: 8, 32>}, {transform_indices = @transform_1, window_bounds = array<i64: 64, 32>}, {transform_indices = @transform_2, window_bounds = array<i64: 3, 64>}, {transform_indices = @transform_3, window_bounds = array<i64: 8, 64>}]} {
    %c0 = arith.constant 0 : index
    %c0_0 = arith.constant 0 : index
    %0 = vector.load %arg1[%c0, %c0_0] : memref<8x32xbf16, #tpu.memory_space<vmem>>, vector<8x32xbf16>
    %c0_1 = arith.constant 0 : index
    %c0_2 = arith.constant 0 : index
    %1 = vector.load %arg2[%c0_1, %c0_2] : memref<64x32xbf16, #tpu.memory_space<vmem>>, vector<64x32xbf16>
    %cst = arith.constant dense<0.000000e+00> : vector<8x64xf32>
    %2 = tpu.matmul %0, %1, %cst {dimension_numbers = #tpu.dot_dimension_numbers<[1], [1], [0], [0], [0, 0, 1, 0], [], []>} : vector<8x32xbf16>, vector<64x32xbf16>, vector<8x64xf32> -> vector<8x64xf32>
    %c0_3 = arith.constant 0 : index
    %c0_4 = arith.constant 0 : index
    %3 = vector.load %arg3[%c0_3, %c0_4] : memref<3x64xf32, #tpu.memory_space<vmem>>, vector<3x64xf32>
    %4 = vector.extract_strided_slice %3 {offsets = [0, 0], sizes = [1, 64], strides = [1, 1]} : vector<3x64xf32> to vector<1x64xf32>
    %5 = vector.broadcast %4 : vector<1x64xf32> to vector<8x64xf32>
    %6 = arith.addf %2, %5 : vector<8x64xf32>
    %cst_5 = arith.constant 0.000000e+00 : f32
    %7 = vector.broadcast %cst_5 : f32 to vector<8x64xf32>
    %8 = arith.maximumf %6, %7 : vector<8x64xf32>
    %cst_6 = arith.constant dense<0.000000e+00> : vector<64xf32>
    %9 = vector.multi_reduction <add>, %8, %cst_6 [0] : vector<8x64xf32> to vector<64xf32>
    %10 = vector.shape_cast %9 : vector<64xf32> to vector<1x64xf32>
    %11 = arith.mulf %8, %8 : vector<8x64xf32>
    %cst_7 = arith.constant dense<0.000000e+00> : vector<64xf32>
    %12 = vector.multi_reduction <add>, %11, %cst_7 [0] : vector<8x64xf32> to vector<64xf32>
    %13 = vector.shape_cast %12 : vector<64xf32> to vector<1x64xf32>
    %cst_8 = arith.constant 1.250000e-01 : f32
    %14 = vector.broadcast %cst_8 : f32 to vector<1x64xf32>
    %15 = arith.mulf %10, %14 : vector<1x64xf32>
    %cst_9 = arith.constant 1.250000e-01 : f32
    %16 = vector.broadcast %cst_9 : f32 to vector<1x64xf32>
    %17 = arith.mulf %13, %16 : vector<1x64xf32>
    %18 = arith.mulf %15, %15 : vector<1x64xf32>
    %19 = arith.subf %17, %18 : vector<1x64xf32>
    %cst_10 = arith.constant 0.000000e+00 : f32
    %20 = vector.broadcast %cst_10 : f32 to vector<1x64xf32>
    %21 = arith.maximumf %19, %20 : vector<1x64xf32>
    %cst_11 = arith.constant 9.99999974E-6 : f32
    %22 = vector.broadcast %cst_11 : f32 to vector<1x64xf32>
    %23 = arith.addf %21, %22 : vector<1x64xf32>
    %24 = math.rsqrt %23 : vector<1x64xf32>
    %25 = vector.extract_strided_slice %3 {offsets = [1, 0], sizes = [1, 64], strides = [1, 1]} : vector<3x64xf32> to vector<1x64xf32>
    %26 = arith.mulf %25, %24 : vector<1x64xf32>
    %27 = vector.extract_strided_slice %3 {offsets = [2, 0], sizes = [1, 64], strides = [1, 1]} : vector<3x64xf32> to vector<1x64xf32>
    %28 = arith.mulf %15, %26 : vector<1x64xf32>
    %29 = arith.subf %27, %28 : vector<1x64xf32>
    %30 = vector.broadcast %26 : vector<1x64xf32> to vector<8x64xf32>
    %31 = arith.mulf %8, %30 : vector<8x64xf32>
    %32 = vector.broadcast %29 : vector<1x64xf32> to vector<8x64xf32>
    %33 = arith.addf %31, %32 : vector<8x64xf32>
    %c0_12 = arith.constant 0 : index
    %c0_13 = arith.constant 0 : index
    %34 = vector.load %arg4[%c0_12, %c0_13] : memref<8x64xf32, #tpu.memory_space<vmem>>, vector<8x64xf32>
    tpu.vector_store %arg4[%c0_12, %c0_13], %33 {strides = array<i32>} : memref<8x64xf32, #tpu.memory_space<vmem>>, vector<8x64xf32>,
    return
  }
  func.func @transform_0(%arg0: i32) -> (i32, i32) {
    %c0_i32 = arith.constant 0 : i32
    %c0_i32_0 = arith.constant 0 : i32
    %c0_i32_1 = arith.constant 0 : i32
    return %c0_i32, %c0_i32_0 : i32, i32
  }
  func.func @transform_1(%arg0: i32) -> (i32, i32) {
    %c0_i32 = arith.constant 0 : i32
    %c0_i32_0 = arith.constant 0 : i32
    return %arg0, %c0_i32 : i32, i32
  }
  func.func @transform_2(%arg0: i32) -> (i32, i32) {
    %c0_i32 = arith.constant 0 : i32
    %c0_i32_0 = arith.constant 0 : i32
    return %c0_i32, %arg0 : i32, i32
  }
  func.func @transform_3(%arg0: i32) -> (i32, i32) {
    %c0_i32 = arith.constant 0 : i32
    %c0_i32_0 = arith.constant 0 : i32
    return %c0_i32, %arg0 : i32, i32
  }
}

</mosaic_0001>

<bundles_post_ra>
// kernel: block_forward.1
= control target key start
LH: loop header
LB: loop body
LE: loop exit
PB: predicated region body
PF: predicated region fallthrough
CT: control target
= control target key end

     0   :  { %v216_v1 = vmov 0.0   ;;  %vm50_vm0 = vcmask 261120   ;;  %vm217_vm1 = vmmov 0   ;;  %s277_s0 = inlined_call_operand.vmem [shape: bf16[8,32], index: 0, kind: input, shape index: {}]   ;;  %s278_s1 = inlined_call_operand.vmem [shape: bf16[64,32], index: 1, kind: input, shape index: {}]   ;;  %s279_s2 = inlined_call_operand.vmem [shape: f32[3,64], index: 2, kind: input, shape index: {}]   ;;  %s280_s3 = inlined_call_operand.hbm [shape: f32[8,64], index: 3, kind: output, shape index: {}]  }
   0x1   :  { %v186_v0 = vld [vmem:[%s278_s1] sm:$0xff]   ;;  %171 = vmatprep.subr.bf16.mxu0 %v216_v1  ;;  %v187_v3 = vld [vmem:[%s278_s1 + $0x8] sm:$0xff]   ;;  %179 = vmatprep.mubr.msk.bf16.mxu0 %vm217_vm1, %v216_v1 }
   0x2   :  { %v55_v2 = vsel %vm50_vm0, %v186_v0, 0 }
   0x3   :  { %172 = vmatpush3.bf16.xpose.msra.mxu0 %v55_v2 }
   0x4   :  { %173 = vmatprep.subr.bf16.mxu0 %v216_v1 }
   0x5   :  { %8 = vsyncpa [#allocation3], 0  ;;  %v58_v4 = vsel %vm50_vm0, %v187_v3, 0  ;;  %v188_v5 = vld [vmem:[%s278_s1 + $0x10] sm:$0xff]   ;;  %v189_v7 = vld [vmem:[%s278_s1 + $0x18] sm:$0xff]   ;;  %v26_v10 = vlaneseq  ;;  %vm107_vm2 = vcmask 523264  }
   0x6   :  { %v61_v6 = vsel %vm50_vm0, %v188_v5, 0  ;;  %v64_v8 = vsel %vm50_vm0, %v189_v7, 0  ;;  %v16_v9 = vld [vmem:[%s277_s0] sm:$0xf]  ;;  %s218_s0 = smov [#allocation2]  }
   0x7   :  { %v27_v11 = vshrl.u32 %v26_v10, 7  ;;  %v25_v13 = vld [vmem:[%s279_s2] sm:$0x7]  ;;  %s153_s1 = sshll.u32 %s218_s0, 4  ;;  %s154_s1 = int_to_ptr.vmem [resolvable:$true] %s153_s1 }
   0x8   :  { %s192_s2 = scalar_lea.vmem %s154_s1, 128  ;;  %p197_p1 = scmp.lt.s32.totalorder %s154_s1, %s154_s1 }
   0x9   :  { %v28_v12 = vsub.s32 0, %v27_v11  ;;  %v138_v44 = vsub.s32 1, %v27_v11  ;;  %v143_v48 = vsub.s32 2, %v27_v11  ;;  %p193_p0 = scmp.ne.s32.totalorder %s154_s1, %s192_s2  ;;  %p198_p2 = scmp.lt.s32.totalorder %s192_s2, %s192_s2 }
   0xb   :  { %174 = vmatpush3.bf16.xpose.msra.mxu0 %v58_v4  ;;  %v29_v14 = vrot.slane %v25_v13, %v28_v12  ;;  %p199_p3 = por %p198_p2, %p197_p1 }
   0xc   :  { %175 = vmatprep.subr.bf16.mxu0 %v216_v1 }
   0xd   :  { %p200_p4 = pnand %p199_p3, %p193_p0 }
  0x13   :  { %176 = vmatpush3.bf16.xpose.msra.mxu0 %v61_v6 }
  0x14   :  { %177 = vmatprep.subr.bf16.mxu0 %v216_v1 }
  0x1b   :  { %178 = vmatpush3.bf16.xpose.msra.mxu0 %v64_v8 }
  0x22   :  { %180 = vmatmul.mubr.msk.bf16.vlgmr.msra.gmra.mrb[0].mxu0 %vm50_vm0, %v16_v9 }
  0xf5   :  { %v100_v15 = vpop.f32.mrb[0].mxu0 }
  0xf6   :  { %v101_v16 = vadd.f32 %v100_v15, %v29_v14  ;;  %v181_v17 = vpop.f32.mrb[1].mxu0 }
  0xf7   :  { %v103_v18 = vpop.f32.mrb[2].mxu0 }
  0xf8   :  { %v106_v19 = vmax.f32 %v101_v16, 0.0  ;;  %v182_v20 = vpop.f32.mrb[3].mxu0 }
  0xfa   :  { %v115_v21 = vmul.f32 %v106_v19, %v106_v19  ;;  %v108_v22 = vsel %vm107_vm2, %v106_v19, 0.0 }
  0xfb   :  { %v109_v23 = vrot.slane %v108_v22, 4 }
  0xfc   :  { %v116_v24 = vsel %vm107_vm2, %v115_v21, 0.0 }
  0xfd   :  { %v110_v25 = vadd.f32 %v109_v23, %v108_v22  ;;  %v117_v26 = vrot.slane %v116_v24, 4 }
  0xff   :  { %v111_v27 = vrot.slane %v110_v25, 2  ;;  %v118_v28 = vadd.f32 %v117_v26, %v116_v24 }
 0x101   :  { %v112_v29 = vadd.f32 %v111_v27, %v110_v25  ;;  %v119_v30 = vrot.slane %v118_v28, 2 }
 0x103   :  { %v113_v31 = vrot.slane %v112_v29, 1  ;;  %v120_v32 = vadd.f32 %v119_v30, %v118_v28 }
 0x105   :  { %v114_v33 = vadd.f32 %v113_v31, %v112_v29  ;;  %v121_v34 = vrot.slane %v120_v32, 1 }
 0x107   :  { %v122_v35 = vadd.f32 %v121_v34, %v120_v32  ;;  %v123_v36 = vmul.f32 0.125, %v114_v33 }
 0x109   :  { %v124_v37 = vmul.f32 0.125, %v122_v35  ;;  %v125_v38 = vmul.f32 %v123_v36, %v123_v36 }
 0x10b   :  { %v126_v39 = vsub.f32 %v124_v37, %v125_v38 }
 0x10d   :  { %v127_v40 = vmax.f32 %v126_v39, 0.0 }
 0x10f   :  { %v128_v41 = vadd.f32 1e-05, %v127_v40 }
 0x111   :  { %190 = vrsqrt.f32 %v128_v41 }
 0x11b   :  { %v191_v42 = vpop.eup %190 }
 0x11c   :  { %v130_v43 = vmul.f32 %v191_v42, %v25_v13 }
 0x11e   :  { %v131_v45 = vmul.f32 %v130_v43, %v123_v36  ;;  %v139_v47 = vrot.slane %v130_v43, %v138_v44 }
 0x120   :  { %v133_v46 = vrot.slane %v131_v45, 7  ;;  %v140_v50 = vmul.f32 %v139_v47, %v106_v19 }
 0x122   :  { %v135_v49 = vsub.f32 %v25_v13, %v133_v46 }
 0x124   :  { %v144_v51 = vrot.slane %v135_v49, %v143_v48 }
 0x126   :  { %v145_v52 = vadd.f32 %v144_v51, %v140_v50 }
 0x128   :  { %146 = vst.msk [vmem:[#allocation2] sm:$0xff] %vm107_vm2, %v145_v52 }
 0x129   :  { %203 = shalt.err (!%p200_p4)
}
 0x12a   :  { %s204_s26 = scalar_lea.hbm %s280_s3, 128 }
 0x12b   :  { %p205_p5 = scmp.ne.s32.totalorder %s280_s3, %s204_s26  ;;  %p208_p6 = scmp.lt.u32.totalorder %s204_s26, %s280_s3 }
 0x12d   :  { %p210_p7 = pnand %p208_p6, %p205_p5 }
 0x12f   :  { %213 = shalt.err (!%p210_p7)
}
 0x130   :  { %156 = dma.vmem_to_hbm [thread:$0]  %s154_s1, 128, %s280_s3, [#allocation3]  }
 0x131   :  { %214 = dma.done.wait [#allocation3], 128  }
 0x132   :  { %215 = vsyncadd [#allocation3], 4294967168 }
 0x133   :  { %160 = vsyncpa [#allocation3], 1 }

</bundles_post_ra>
